<compile_context>
chip_gen: v7x
topology: tpu7x:2x2x1
jax: 0.10.0
libtpu: 0.0.40
codegen_flags: <defaults>
</compile_context>

<pallas_src>
import functools

import jax
import jax.numpy as jnp
import numpy as np
from jax import lax
from jax.experimental import pallas as pl
from jax.experimental.pallas import tpu as pltpu


# ----------------------------- Pallas kernels -------------------------------

def _eca_pool_kernel(x_ref, mean_ref, *, inv_hw):
    # Tiled global-average-pool.  grid = (B, nHe); x_ref: (1, THe, W, C) f32;
    # mean_ref: (1, 1, C) f32 accumulator (same output block across the row axis).
    i = pl.program_id(1)

    @pl.when(i == 0)
    def _init():
        mean_ref[...] = jnp.zeros_like(mean_ref)

    mean_ref[...] += jnp.sum(x_ref[0], axis=(0, 1), keepdims=True)

    @pl.when(i == pl.num_programs(1) - 1)
    def _finalize():
        mean_ref[...] = mean_ref[...] * inv_hw


def _block_kernel(x_ref, halo_ref, wf_ref, scale_ref, shift_ref, w2t_ref, xres_ref,
                  out_ref, xpad_ref):
    # One (batch, row-tile) step.
    #  x_ref    : (1, TH, W, C) f32  NHWC rows of this tile (conv input)
    #  halo_ref : (1, 2, W, C)  f32  row above / row below this tile (zeros at image border)
    #  wf_ref   : (1, 3, 3C, hidden) bf16  per-batch folded (ECA-perm + PConv3_3 + conv1) weight
    #  scale/shift : (1, hidden) f32  folded BatchNorm (inference)
    #  w2t_ref  : (C, hidden) bf16   conv2 (1x1), stored (out_ch, in_ch)
    #  xres_ref : (1, C, TH*W) f32   residual in NCHW-flat layout (lane-dense)
    #  out_ref  : (1, C, TH*W) f32   output in NCHW-flat layout (lane-dense stores)
    #  xpad_ref : VMEM scratch (TH+2, W+2, C) bf16  zero-bordered halo tile
    _, TH, W, C = x_ref.shape
    hidden = w2t_ref.shape[1]
    M = TH * W

    # ---- build the halo tile: zero ONLY the 1-px left/right border columns; the top/bottom
    #      rows come from the precomputed halo rows and the interior is fully overwritten.
    zcol = jnp.zeros((TH + 2, 1, C), jnp.bfloat16)
    xpad_ref[:, 0:1, :] = zcol
    xpad_ref[:, W + 1:W + 2, :] = zcol
    hal = halo_ref[0].astype(jnp.bfloat16)                      # (2, W, C)
    xpad_ref[0:1, 1:W + 1, :] = hal[0:1]
    xpad_ref[TH + 1:TH + 2, 1:W + 1, :] = hal[1:2]
    xpad_ref[1:TH + 1, 1:W + 1, :] = x_ref[0].astype(jnp.bfloat16)

    # ---- fused (ECA permute + PConv3_3 + conv1): a 3x3 SAME conv C -> hidden with the K
    #      dimension grouped over the three dx taps (K = 3C per matmul, 3 matmuls total).
    h = jnp.zeros((M, hidden), jnp.float32)
    for dy in range(3):
        taps = jnp.concatenate(
            [xpad_ref[dy:dy + TH, dx:dx + W, :].reshape(M, C) for dx in range(3)],
            axis=-1)                                            # (M, 3C) bf16
        h = h + jnp.dot(taps, wf_ref[0, dy],                    # (3C, hidden) bf16
                        preferred_element_type=jnp.float32)

    # ---- folded BatchNorm (inference) + ReLU in f32.
    h = h * scale_ref[...] + shift_ref[...]
    h = jnp.maximum(h, 0.0)

    # ---- conv2 (1x1) computed transposed so the residual add and the store are lane-dense
    #      (last dim TH*W >= 128), avoiding masked partial stores when C < 128.
    y_t = lax.dot_general(w2t_ref[...], h.astype(jnp.bfloat16),
                          dimension_numbers=(((1,), (1,)), ((), ())),
                          preferred_element_type=jnp.float32)   # (C, M)

    out_ref[0] = xres_ref[0] + y_t


# ------------------------------ wrapper / glue -------------------------------

def make_params(key, dim, expand_ratio=2):
    dim_conv = dim // 3
    dim_last = dim - 2 * dim_conv
    hidden = int(dim * expand_ratio)
    ks = jax.random.split(key, 8)
    # Parameters generated in PyTorch layouts, converted later.
    w_eca = 0.5 * jax.random.normal(ks[0], (3,), jnp.float32)                      # Conv1d(1,1,3)
    w3_t = jax.random.normal(ks[1], (dim_last, dim_last, 3, 3), jnp.float32) / np.sqrt(dim_last * 9)
    w1_t = jax.random.normal(ks[2], (hidden, dim, 1, 1), jnp.float32) / np.sqrt(dim)
    w2_t = jax.random.normal(ks[3], (dim, hidden, 1, 1), jnp.float32) / np.sqrt(hidden)
    gamma = 1.0 + 0.1 * jax.random.normal(ks[4], (hidden,), jnp.float32)
    beta = 0.1 * jax.random.normal(ks[5], (hidden,), jnp.float32)
    run_mean = 0.1 * jax.random.normal(ks[6], (hidden,), jnp.float32)
    run_var = jnp.abs(1.0 + 0.1 * jax.random.normal(ks[7], (hidden,), jnp.float32))
    return dict(w_eca=w_eca, w3_t=w3_t, w1_t=w1_t, w2_t=w2_t,
                gamma=gamma, beta=beta, run_mean=run_mean, run_var=run_var,
                dim_conv=dim_conv, dim_last=dim_last, hidden=hidden)


def _vmem_limit_bytes():
    # ~half of physical VMEM: 64 MB on v5e/v6e (128 MiB), 32 MB on v7x (64 MiB per TC).
    try:
        cap = int(pltpu.get_tpu_info().vmem_capacity_bytes)
    except Exception:
        cap = 64 * 1024 * 1024
    return max(32 * 1024 * 1024, min(cap // 2, 96 * 1024 * 1024))


def _pick_row_tile(H, W, C, target_bytes=2 << 20):
    # Largest divisor of H with a ~target-sized row block whose flattened output block
    # (TH*W) is a multiple of 128 lanes; fall back to the full plane.
    pref = int(max(1, min(H, target_bytes // max(1, W * C * 4))))
    for t in range(pref, 0, -1):
        if H % t == 0 and (t * W) % 128 == 0:
            return t
    return H


def _pick_pool_tile(H, W, C, target_bytes=4 << 20):
    pref = int(max(1, min(H, target_bytes // max(1, W * C * 4))))
    for t in range(pref, 0, -1):
        if H % t == 0:
            return t
    return H


def fasternet_block(x_nchw, p, eps=1e-5, row_tile=None):
    B, C, H, W = x_nchw.shape
    dc, hidden = p["dim_conv"], p["hidden"]
    vmem_limit = _vmem_limit_bytes()

    x_nchw = x_nchw.astype(jnp.float32)
    x_nhwc = jnp.transpose(x_nchw, (0, 2, 3, 1))                       # NHWC (channels on lanes)
    x_res = x_nchw.reshape(B, C, H * W)                                # residual, lane-dense layout

    # ---------------- ECA channel means (tiled Pallas reduction) ----------------
    THe = _pick_pool_tile(H, W, C)
    nHe = H // THe
    pooled = pl.pallas_call(
        functools.partial(_eca_pool_kernel, inv_hw=1.0 / float(H * W)),
        out_shape=jax.ShapeDtypeStruct((B, 1, C), jnp.float32),
        grid=(B, nHe),
        in_specs=[pl.BlockSpec((1, THe, W, C), lambda b, i: (b, i, 0, 0))],
        out_specs=pl.BlockSpec((1, 1, C), lambda b, i: (b, 0, 0)),
        compiler_params=pltpu.CompilerParams(
            dimension_semantics=("parallel", "arbitrary"),
            vmem_limit_bytes=vmem_limit),
    )(x_nhwc)
    means = pooled[:, 0, :]                                            # (B, C)

    # Tiny (B, C) glue: conv1d(k=3, pad=1) over channels + sigmoid + descending argsort
    # (== torch.topk(largest=True, sorted=True)); folded into the weights below instead of
    # permuting the activation.  Note: tie-breaking may differ from torch.topk.
    w = p["w_eca"]
    mp = jnp.pad(means, ((0, 0), (1, 1)))
    scores = jax.nn.sigmoid(w[0] * mp[:, :-2] + w[1] * mp[:, 1:-1] + w[2] * mp[:, 2:])
    order = jnp.argsort(-scores, axis=1)                               # (B, C)

    # ------------- fold ECA permutation + PConv3_3 + conv1 into per-batch weights -------------
    w3 = jnp.transpose(p["w3_t"], (2, 3, 1, 0))                        # (3, 3, cin, cout)
    w1 = jnp.transpose(p["w1_t"][:, :, 0, 0], (1, 0))                  # (C, hidden)
    w2t = p["w2_t"][:, :, 0, 0]                                        # (C, hidden)  (out_ch, in_ch)
    # Fold conv1 columns for the conv branch through the 3x3 weight.
    T = jnp.einsum("yxio,od->yxid", w3, w1[2 * dc:, :])                # (3, 3, dim_last, hidden)

    def fold_one(ord_b):
        # Wb[ky,kx,c,:] so that SAME-conv3x3(x; Wb) == conv1(concat(x1, x2, conv3x3(x3)))
        # with the ECA permutation applied to the channels of x.
        Wb = jnp.zeros((3, 3, C, hidden), jnp.float32)
        Wb = Wb.at[:, :, ord_b[2 * dc:], :].set(T)                     # conv-branch channels
        Wb = Wb.at[1, 1, ord_b[:2 * dc], :].add(w1[:2 * dc, :])        # pass-through (center tap)
        return Wb

    # (B, 3, 3, C, hidden) -> (B, 3(dy), 3C(dx-major), hidden), matching the in-kernel tap concat.
    wf = jax.vmap(fold_one)(order).reshape(B, 3, 3 * C, hidden).astype(jnp.bfloat16)

    scale = p["gamma"] / jnp.sqrt(p["run_var"] + eps)                  # folded BN (inference)
    shift = p["beta"] - p["run_mean"] * scale
    scale = scale.reshape(1, hidden).astype(jnp.float32)
    shift = shift.reshape(1, hidden).astype(jnp.float32)
    w2t = w2t.astype(jnp.bfloat16)

    # ---------------- row tiling + halo rows ----------------
    if row_tile is None:
        TH = _pick_row_tile(H, W, C)
    else:
        TH = int(row_tile)
        assert H % TH == 0, "row_tile must divide H"
        assert TH == H or (TH * W) % 128 == 0, "need TH*W % 128 == 0 (or full-plane tile)"
    nH = H // TH

    # halos[b, 2*i]   = image row just above tile i (zeros for i == 0)
    # halos[b, 2*i+1] = image row just below tile i (zeros for i == nH-1)
    halos = jnp.zeros((B, 2 * nH, W, C), jnp.float32)
    if nH > 1:
        halos = halos.at[:, 2::2].set(x_nhwc[:, TH - 1:H - 1:TH])          # tops of tiles 1..nH-1
        halos = halos.at[:, 1:2 * nH - 2:2].set(x_nhwc[:, TH::TH])         # bottoms of tiles 0..nH-2

    # ---------------- fused main kernel ----------------
    out = pl.pallas_call(
        _block_kernel,
        out_shape=jax.ShapeDtypeStruct((B, C, H * W), jnp.float32),
        grid=(B, nH),
        in_specs=[
            pl.BlockSpec((1, TH, W, C), lambda b, i: (b, i, 0, 0)),        # conv input rows
            pl.BlockSpec((1, 2, W, C), lambda b, i: (b, i, 0, 0)),         # halo rows (top/bottom)
            pl.BlockSpec((1, 3, 3 * C, hidden), lambda b, i: (b, 0, 0, 0)),  # per-batch folded weight
            pl.BlockSpec((1, hidden), lambda b, i: (0, 0)),                # BN scale
            pl.BlockSpec((1, hidden), lambda b, i: (0, 0)),                # BN shift
            pl.BlockSpec((C, hidden), lambda b, i: (0, 0)),                # conv2 weight (C, hidden)
            pl.BlockSpec((1, C, TH * W), lambda b, i: (b, 0, i)),          # residual (NCHW-flat)
        ],
        out_specs=pl.BlockSpec((1, C, TH * W), lambda b, i: (b, 0, i)),    # lane-dense output
        scratch_shapes=[pltpu.VMEM((TH + 2, W + 2, C), jnp.bfloat16)],     # padded halo tile
        compiler_params=pltpu.CompilerParams(
            dimension_semantics=("parallel", "parallel"),                  # megacore over (B, rows)
            vmem_limit_bytes=vmem_limit),
    )(x_nhwc, halos, wf, scale, shift, w2t, x_res)

    return out.reshape(B, C, H, W)                                         # already NCHW


# ------------------------------ pure-JAX reference ---------------------------

def reference(x_nchw, p, eps=1e-5):
    dim_conv, hidden = p["dim_conv"], p["hidden"]
    x = jnp.transpose(x_nchw, (0, 2, 3, 1)).astype(jnp.float32)        # NHWC
    B, H, W, C = x.shape

    # ECA scores
    ym = jnp.mean(x, axis=(1, 2))                                      # (B, C)
    ymp = jnp.pad(ym, ((0, 0), (1, 1)))
    w = p["w_eca"]
    s = w[0] * ymp[:, :-2] + w[1] * ymp[:, 1:-1] + w[2] * ymp[:, 2:]
    scores = jax.nn.sigmoid(s)
    order = jnp.argsort(-scores, axis=1)
    xp = jnp.take_along_axis(x, order[:, None, None, :], axis=3)

    # PConv3_3
    x12 = xp[..., : 2 * dim_conv]
    x3 = xp[..., 2 * dim_conv:]
    w3_hwio = jnp.transpose(p["w3_t"], (2, 3, 1, 0))
    x3c = lax.conv_general_dilated(x3, w3_hwio, (1, 1), "SAME",
                                   dimension_numbers=("NHWC", "HWIO", "NHWC"))
    cat = jnp.concatenate([x12, x3c], axis=-1)

    # conv1 -> BN(eval) -> ReLU -> conv2 -> residual
    w1 = jnp.transpose(p["w1_t"][:, :, 0, 0], (1, 0))
    w2 = jnp.transpose(p["w2_t"][:, :, 0, 0], (1, 0))
    scale = p["gamma"] / jnp.sqrt(p["run_var"] + eps)
    shift = p["beta"] - p["run_mean"] * scale
    h = jnp.einsum("bhwc,cd->bhwd", cat, w1)
    h = h * scale + shift
    h = jnp.maximum(h, 0.0)
    y = jnp.einsum("bhwd,dc->bhwc", h, w2)
    out = x + y
    return jnp.transpose(out, (0, 3, 1, 2))


# ---------------------------------- main --------------------------------------

if __name__ == "__main__":
    key = jax.random.PRNGKey(0)
    kx, kp = jax.random.split(key)

    # small shapes consistent with the module (dim must be >= 3 for n_div=3)
    B, C, H, W = 2, 12, 16, 16
    x = jax.random.normal(kx, (B, C, H, W), jnp.float32)
    params = make_params(kp, dim=C, expand_ratio=2)

    ref = reference(x, params)

    # auto row tile (single full-plane tile at this small H)
    out = fasternet_block(x, params)
    out = jax.block_until_ready(out)
    assert out.shape == (B, C, H, W)
    np.testing.assert_allclose(np.asarray(out), np.asarray(ref), rtol=5e-2, atol=5e-2)

    # forced 8-row tiles: exercises the H-row-tiling + halo-row path (nH = 2)
    out_tiled = fasternet_block(x, params, row_tile=8)
    out_tiled = jax.block_until_ready(out_tiled)
    np.testing.assert_allclose(np.asarray(out_tiled), np.asarray(ref), rtol=5e-2, atol=5e-2)

    print("KERNEL_OK")
</pallas_src>

<mosaic_0001>
module attributes {stable_mosaic.version = 11 : i64} {
  func.func @_eca_pool_kernel(%arg0: i32, %arg1: i32, %arg2: memref<1x16x16x12xf32, #tpu.memory_space<vmem>>, %arg3: memref<1x1x12xf32, #tpu.memory_space<vmem>>) attributes {dimension_semantics = [#tpu.dimension_semantics<parallel>, #tpu.dimension_semantics<arbitrary>], iteration_bounds = array<i64: 2, 1>, scalar_prefetch = 0 : i64, scratch_operands = 0 : i64, tpu.core_type = #tpu.core_type<tc>, window_params = [{transform_indices = @transform_0, window_bounds = array<i64: 1, 16, 16, 12>}, {transform_indices = @transform_1, window_bounds = array<i64: 1, 1, 12>}]} {
    %c0_i32 = arith.constant 0 : i32
    %0 = arith.cmpi eq, %arg1, %c0_i32 : i32
    %1 = arith.extui %0 : i1 to i32
    %c0_i32_0 = arith.constant 0 : i32
    %2 = arith.cmpi ne, %1, %c0_i32_0 : i32
    scf.if %2 {
      %cst_12 = arith.constant 0.000000e+00 : f32
      %13 = vector.broadcast %cst_12 : f32 to vector<1x1x12xf32>
      %c0_13 = arith.constant 0 : index
      %c0_14 = arith.constant 0 : index
      %c0_15 = arith.constant 0 : index
      %14 = vector.load %arg3[%c0_13, %c0_14, %c0_15] : memref<1x1x12xf32, #tpu.memory_space<vmem>>, vector<1x1x12xf32>
      tpu.vector_store %arg3[%c0_13, %c0_14, %c0_15], %13 {strides = array<i32>} : memref<1x1x12xf32, #tpu.memory_space<vmem>>, vector<1x1x12xf32>,
    } else {
    }
    %c0 = arith.constant 0 : index
    %c0_1 = arith.constant 0 : index
    %c0_2 = arith.constant 0 : index
    %3 = vector.load %arg3[%c0, %c0_1, %c0_2] : memref<1x1x12xf32, #tpu.memory_space<vmem>>, vector<1x1x12xf32>
    %c0_3 = arith.constant 0 : index
    %c0_4 = arith.constant 0 : index
    %c0_5 = arith.constant 0 : index
    %c0_6 = arith.constant 0 : index
    %4 = vector.load %arg2[%c0_3, %c0_4, %c0_5, %c0_6] : memref<1x16x16x12xf32, #tpu.memory_space<vmem>>, vector<1x16x16x12xf32>
    %5 = vector.shape_cast %4 : vector<1x16x16x12xf32> to vector<16x16x12xf32>
    %cst = arith.constant dense<0.000000e+00> : vector<12xf32>
    %6 = vector.multi_reduction <add>, %5, %cst [0, 1] : vector<16x16x12xf32> to vector<12xf32>
    %7 = vector.shape_cast %6 : vector<12xf32> to vector<1x1x12xf32>
    %8 = arith.addf %3, %7 : vector<1x1x12xf32>
    %c0_7 = arith.constant 0 : index
    %c0_8 = arith.constant 0 : index
    %c0_9 = arith.constant 0 : index
    %9 = vector.load %arg3[%c0_7, %c0_8, %c0_9] : memref<1x1x12xf32, #tpu.memory_space<vmem>>, vector<1x1x12xf32>
    tpu.vector_store %arg3[%c0_7, %c0_8, %c0_9], %8 {strides = array<i32>} : memref<1x1x12xf32, #tpu.memory_space<vmem>>, vector<1x1x12xf32>,
    %c0_i32_10 = arith.constant 0 : i32
    %10 = arith.cmpi eq, %arg1, %c0_i32_10 : i32
    %11 = arith.extui %10 : i1 to i32
    %c0_i32_11 = arith.constant 0 : i32
    %12 = arith.cmpi ne, %11, %c0_i32_11 : i32
    scf.if %12 {
      %c0_12 = arith.constant 0 : index
      %c0_13 = arith.constant 0 : index
      %c0_14 = arith.constant 0 : index
      %13 = vector.load %arg3[%c0_12, %c0_13, %c0_14] : memref<1x1x12xf32, #tpu.memory_space<vmem>>, vector<1x1x12xf32>
      %cst_15 = arith.constant 3.906250e-03 : f32
      %14 = vector.broadcast %cst_15 : f32 to vector<1x1x12xf32>
      %15 = arith.mulf %13, %14 : vector<1x1x12xf32>
      %c0_16 = arith.constant 0 : index
      %c0_17 = arith.constant 0 : index
      %c0_18 = arith.constant 0 : index
      %16 = vector.load %arg3[%c0_16, %c0_17, %c0_18] : memref<1x1x12xf32, #tpu.memory_space<vmem>>, vector<1x1x12xf32>
      tpu.vector_store %arg3[%c0_16, %c0_17, %c0_18], %15 {strides = array<i32>} : memref<1x1x12xf32, #tpu.memory_space<vmem>>, vector<1x1x12xf32>,
    } else {
    }
    return
  }
  func.func @transform_0(%arg0: i32, %arg1: i32) -> (i32, i32, i32, i32) {
    %c0_i32 = arith.constant 0 : i32
    %c0_i32_0 = arith.constant 0 : i32
    %c0_i32_1 = arith.constant 0 : i32
    return %arg0, %arg1, %c0_i32, %c0_i32_0 : i32, i32, i32, i32
  }
  func.func @transform_1(%arg0: i32, %arg1: i32) -> (i32, i32, i32) {
    %c0_i32 = arith.constant 0 : i32
    %c0_i32_0 = arith.constant 0 : i32
    %c0_i32_1 = arith.constant 0 : i32
    return %arg0, %c0_i32, %c0_i32_0 : i32, i32, i32
  }
}

</mosaic_0001>

<bundles_post_ra>
// kernel: tpu_custom_call.1
= control target key start
LH: loop header
LB: loop body
LE: loop exit
PB: predicated region body
PF: predicated region fallthrough
CT: control target
= control target key end

     0   :  { %6 = vsyncpa [#allocation3], 0  ;;  %s700_s0 = inlined_call_operand.vmem [shape: f32[2,16,16,12], index: 0, kind: input, shape index: {}]   ;;  %s701_s1 = inlined_call_operand.hbm [shape: f32[2,1,12], index: 1, kind: output, shape index: {}]  }
   0x1   :  { %8 = vsyncpa [#allocation3 + $0x1], 0  ;;  %s507_s6 = smov 0   ;;  %s509_s7 = smov 0  }
   0x2   :  { %s511_s8 = smov 0   ;;  %s513_s9 = smov 0  }
   0x3   :  { %s515_s10 = smov 0   ;;  %s517_s11 = smov 0  }
   0x4 LB: > { %s348_s12 = sadd.s32 4294967295, %s493_s11   ;;  %s349_s13 = sadd.s32 4294967294, %s493_s11   ;;  %s493_s11 = sphi %s517_s11, %s14_s11   ;;  %s489_s10 = sphi %s515_s10, %s708_s10   ;;  %s485_s9 = sphi %s513_s9, %s707_s9   ;;  %s481_s8 = sphi %s511_s8, %s706_s8   ;;  %s477_s7 = sphi %s509_s7, %s705_s7   ;;  %s473_s6 = sphi %s507_s6, %s704_s6  }
   0x5   : > { %s26_s14 = sadd.s32 1, %s489_s10  ;;  %s61_s15 = sadd.s32 1, %s481_s8 }
   0x6   : > { %p28_p0 = scmp.ge.s32.totalorder %s26_s14, 2  ;;  %p71_p1 = scmp.ne.s32.totalorder %s481_s8, %s477_s7 }
   0x7   : > { %p72_p2 = scmp.eq.s32.totalorder %s348_s12, 1  ;;  %p77_p3 = scmp.ne.s32.totalorder %s477_s7, %s473_s6 }
   0x8   : > { %s710_s14 = smov (%p28_p0, %s26_s14), 0  ;;  %p78_p5 = scmp.eq.s32.totalorder %s349_s13, 1 }
   0x9   : > { %p547_p4 = por %p72_p2, %p71_p1  ;;  %s58_s17 = ssub.s32 %s489_s10, %s710_s14 }
   0xa   : > { %p352_p6 = scmp.ge.s32.totalorder %s493_s11, 1  ;;  %p59_p7 = scmp.eq.s32.totalorder %s58_s17, 0 }
   0xb   : > { %p554_p8 = por %p78_p5, %p77_p3  ;;  %p110_p9 = scmp.lt.s32.totalorder %s493_s11, 3 }
   0xc   : > { %s560_s19 = scalar_select %p59_p7, %s481_s8, %s61_s15  }
   0xd   : > { %p111_p10 = pnand %p352_p6, %p110_p9 }
   0xe   : > { %s132_s20 = sand.u32 (!%p111_p10), 1, %s477_s7   ;;  %vm149_vm0 = vcmask (!%p111_p10), 90112   ;;  %p135_p11 = scmp.lt.s32.totalorder (!%p111_p10), %s485_s9, 1  ;;  %v495_v0 = vmov (!%p111_p10), 0.0   ;;  %vm184_vm1 = vcmask (!%p111_p10), 97280  }
   0xf   : > { %114 = sbr.rel (%p111_p10) target bundleno = 128 (0x80), region = 24  ;;  %s566_s21 = scalar_lea.vmem (!%p111_p10), [#allocation2], %s132_s20 }
  0x10   : > { %150 = vst.msk [vmem:[%s566_s21] sm:$0x1] (!%p111_p10), %vm149_vm0, %v495_v0  ;;  %s355_s27 = sshll.u32 (!%p111_p10), %s485_s9, 4  ;;  %s276_s28 = sshll.u32 (!%p111_p10), %s566_s21, 4  ;;  %s651_s28 = int_to_ptr.vmem [resolvable:$true] %s276_s28 }
  0x11   : > { %s649_s2 = scalar_lea.hbm (!%p111_p10), %s701_s1, %s355_s27  ;;  %s264_s3 = scalar_lea.sflag (!%p111_p10), [#allocation3], %s132_s20 }
  0x12   : > { %s415_s4 = scalar_lea.vmem (!%p111_p10), %s651_s28, 16  ;;  %s496_s5 = smov (!%p111_p10), [#allocation2]  }
  0x13   : > { %p416_p12 = scmp.ne.s32.totalorder (!%p111_p10), %s651_s28, %s415_s4 }
  0x15   : > { %p417_p13 = pnand (!%p111_p10), %p416_p12, %p547_p4 }
  0x16   : > { %s136_s22 = scalar_select %p135_p11, %s485_s9, 1 }
  0x17   : > { %p418_p0 = pneg %p417_p13  ;;  %s419_s9 = sshll.u32 %s496_s5, 4  ;;  %s420_s9 = int_to_ptr.vmem [resolvable:$false] %s419_s9 }
  0x18   : > { %s358_s23 = sshll.u32 %s136_s22, 8  ;;  %s421_s12 = scalar_lea.vmem %s420_s9, 32 }
  0x19   : > { %s574_s26 = scalar_lea.vmem %s700_s0, %s358_s23  ;;  %p422_p1 = scmp.lt.s32.totalorder %s651_s28, %s420_s9 }
  0x1a   : > { %v152_v1 = vld [vmem:[%s574_s26] sm:$0xff]  ;;  %v153_v2 = vld [vmem:[%s574_s26 + $0x8] sm:$0xff]  ;;  %v154_v3 = vld [vmem:[%s574_s26 + $0x10] sm:$0xff]  ;;  %p423_p2 = scmp.lt.s32.totalorder %s421_s12, %s415_s4 }
  0x1b   : > { %v155_v4 = vld [vmem:[%s574_s26 + $0x18] sm:$0xff]  ;;  %v185_v5 = vsel %vm184_vm1, %v152_v1, 0.0  ;;  %v186_v6 = vsel %vm184_vm1, %v153_v2, 0.0  ;;  %v188_v7 = vsel %vm184_vm1, %v154_v3, 0.0  ;;  %v156_v8 = vld [vmem:[%s574_s26 + $0x20] sm:$0xff]  ;;  %v157_v11 = vld [vmem:[%s574_s26 + $0x28] sm:$0xff] }
  0x1c   : > { %v187_v9 = vadd.f32 %v186_v6, %v185_v5  ;;  %v190_v10 = vsel %vm184_vm1, %v155_v4, 0.0  ;;  %v192_v13 = vsel %vm184_vm1, %v156_v8, 0.0  ;;  %v158_v14 = vld [vmem:[%s574_s26 + $0x30] sm:$0xff]  ;;  %v194_v16 = vsel %vm184_vm1, %v157_v11, 0.0  ;;  %v159_v17 = vld [vmem:[%s574_s26 + $0x38] sm:$0xff]  ;;  %v160_v20 = vld [vmem:[%s574_s26 + $0x40] sm:$0xff]  ;;  %p424_p3 = por %p423_p2, %p422_p1 }
  0x1d   : > { %v196_v19 = vsel %vm184_vm1, %v158_v14, 0.0  ;;  %v198_v22 = vsel %vm184_vm1, %v159_v17, 0.0  ;;  %v161_v23 = vld [vmem:[%s574_s26 + $0x48] sm:$0xff]  ;;  %v200_v25 = vsel %vm184_vm1, %v160_v20, 0.0  ;;  %v162_v26 = vld [vmem:[%s574_s26 + $0x50] sm:$0xff]  ;;  %v163_v29 = vld [vmem:[%s574_s26 + $0x58] sm:$0xff] }
  0x1e   : > { %v189_v12 = vadd.f32 %v188_v7, %v187_v9  ;;  %v202_v28 = vsel %vm184_vm1, %v161_v23, 0.0  ;;  %v204_v31 = vsel %vm184_vm1, %v162_v26, 0.0  ;;  %v164_v32 = vld [vmem:[%s574_s26 + $0x60] sm:$0xff]  ;;  %v206_v34 = vsel %vm184_vm1, %v163_v29, 0.0  ;;  %v165_v35 = vld [vmem:[%s574_s26 + $0x68] sm:$0xff]  ;;  %v166_v38 = vld [vmem:[%s574_s26 + $0x70] sm:$0xff]  ;;  %p425_p5 = pnand %p424_p3, %p418_p0 }
  0x1f   : > { %v208_v37 = vsel %vm184_vm1, %v164_v32, 0.0  ;;  %v210_v40 = vsel %vm184_vm1, %v165_v35, 0.0  ;;  %v167_v41 = vld [vmem:[%s574_s26 + $0x78] sm:$0xff]  ;;  %v212_v43 = vsel %vm184_vm1, %v166_v38, 0.0  ;;  %v168_v44 = vld [vmem:[%s574_s26 + $0x80] sm:$0xff]  ;;  %v169_v47 = vld [vmem:[%s574_s26 + $0x88] sm:$0xff] }
  0x20   : > { %v191_v15 = vadd.f32 %v190_v10, %v189_v12  ;;  %v214_v46 = vsel %vm184_vm1, %v167_v41, 0.0  ;;  %v216_v49 = vsel %vm184_vm1, %v168_v44, 0.0  ;;  %v170_v50 = vld [vmem:[%s574_s26 + $0x90] sm:$0xff]  ;;  %v218_v52 = vsel %vm184_vm1, %v169_v47, 0.0  ;;  %v171_v53 = vld [vmem:[%s574_s26 + $0x98] sm:$0xff]  ;;  %v172_v56 = vld [vmem:[%s574_s26 + $0xa0] sm:$0xff] }
  0x21   : > { %v220_v55 = vsel %vm184_vm1, %v170_v50, 0.0  ;;  %v222_v58 = vsel %vm184_vm1, %v171_v53, 0.0  ;;  %v173_v59 = vld [vmem:[%s574_s26 + $0xa8] sm:$0xff]  ;;  %v224_v61 = vsel %vm184_vm1, %v172_v56, 0.0  ;;  %v174_v62 = vld [vmem:[%s574_s26 + $0xb0] sm:$0xff]  ;;  %v175_v1 = vld [vmem:[%s574_s26 + $0xb8] sm:$0xff] }
  0x22   : > { %v193_v18 = vadd.f32 %v192_v13, %v191_v15  ;;  %v226_v0 = vsel %vm184_vm1, %v173_v59, 0.0  ;;  %v228_v3 = vsel %vm184_vm1, %v174_v62, 0.0  ;;  %v176_v4 = vld [vmem:[%s574_s26 + $0xc0] sm:$0xff]  ;;  %v230_v6 = vsel %vm184_vm1, %v175_v1, 0.0  ;;  %v177_v7 = vld [vmem:[%s574_s26 + $0xc8] sm:$0xff]  ;;  %v178_v10 = vld [vmem:[%s574_s26 + $0xd0] sm:$0xff] }
  0x23   : > { %v232_v9 = vsel %vm184_vm1, %v176_v4, 0.0  ;;  %v234_v12 = vsel %vm184_vm1, %v177_v7, 0.0  ;;  %v179_v13 = vld [vmem:[%s574_s26 + $0xd8] sm:$0xff]  ;;  %v236_v15 = vsel %vm184_vm1, %v178_v10, 0.0 }
  0x24   : > { %v195_v21 = vadd.f32 %v194_v16, %v193_v18  ;;  %v180_v16 = vld [vmem:[%s574_s26 + $0xe0] sm:$0xff]  ;;  %v238_v18 = vsel %vm184_vm1, %v179_v13, 0.0 }
  0x26   : > { %v197_v24 = vadd.f32 %v196_v19, %v195_v21  ;;  %v181_v19 = vld [vmem:[%s574_s26 + $0xe8] sm:$0xff]  ;;  %v240_v21 = vsel %vm184_vm1, %v180_v16, 0.0 }
  0x28   : > { %v199_v27 = vadd.f32 %v198_v22, %v197_v24  ;;  %v182_v22 = vld [vmem:[%s574_s26 + $0xf0] sm:$0xff]  ;;  %v242_v24 = vsel %vm184_vm1, %v181_v19, 0.0 }
  0x2a   : > { %v201_v30 = vadd.f32 %v200_v25, %v199_v27  ;;  %v183_v25 = vld [vmem:[%s574_s26 + $0xf8] sm:$0xff]  ;;  %v244_v27 = vsel %vm184_vm1, %v182_v22, 0.0 }
  0x2b   : > { %v246_v29 = vsel %vm184_vm1, %v183_v25, 0.0 }
  0x2c   : > { %v203_v33 = vadd.f32 %v202_v28, %v201_v30 }
  0x2e   : > { %v205_v36 = vadd.f32 %v204_v31, %v203_v33 }
  0x30   : > { %v207_v39 = vadd.f32 %v206_v34, %v205_v36 }
  0x32   : > { %v209_v42 = vadd.f32 %v208_v37, %v207_v39  ;;  %v151_v37 = vld [vmem:[%s566_s21] sm:$0x1] }
  0x34   : > { %v211_v45 = vadd.f32 %v210_v40, %v209_v42 }
  0x36   : > { %v213_v48 = vadd.f32 %v212_v43, %v211_v45 }
  0x38   : > { %v215_v51 = vadd.f32 %v214_v46, %v213_v48 }
  0x3a   : > { %v217_v54 = vadd.f32 %v216_v49, %v215_v51 }
  0x3c   : > { %v219_v57 = vadd.f32 %v218_v52, %v217_v54 }
  0x3e   : > { %v221_v60 = vadd.f32 %v220_v55, %v219_v57 }
  0x40   : > { %v223_v63 = vadd.f32 %v222_v58, %v221_v60 }
  0x42   : > { %v225_v2 = vadd.f32 %v224_v61, %v223_v63 }
  0x44   : > { %v227_v5 = vadd.f32 %v226_v0, %v225_v2 }
  0x46   : > { %v229_v8 = vadd.f32 %v228_v3, %v227_v5 }
  0x48   : > { %v231_v11 = vadd.f32 %v230_v6, %v229_v8 }
  0x4a   : > { %v233_v14 = vadd.f32 %v232_v9, %v231_v11 }
  0x4c   : > { %v235_v17 = vadd.f32 %v234_v12, %v233_v14 }
  0x4e   : > { %v237_v20 = vadd.f32 %v236_v15, %v235_v17 }
  0x50   : > { %v239_v23 = vadd.f32 %v238_v18, %v237_v20 }
  0x52   : > { %v241_v26 = vadd.f32 %v240_v21, %v239_v23 }
  0x54   : > { %v243_v28 = vadd.f32 %v242_v24, %v241_v26 }
  0x56   : > { %v245_v30 = vadd.f32 %v244_v27, %v243_v28 }
  0x58   : > { %v247_v31 = vadd.f32 %v246_v29, %v245_v30 }
  0x5a   : > { %v248_v32 = vrot.slane %v247_v31, 4 }
  0x5c   : > { %v249_v33 = vadd.f32 %v248_v32, %v247_v31 }
  0x5e   : > { %v250_v34 = vrot.slane %v249_v33, 2 }
  0x60   : > { %v251_v35 = vadd.f32 %v250_v34, %v249_v33 }
  0x62   : > { %v252_v36 = vrot.slane %v251_v35, 1 }
  0x64   : > { %v253_v38 = vadd.f32 %v252_v36, %v251_v35 }
  0x66   : > { %v254_v39 = vadd.f32 %v253_v38, %v151_v37 }
  0x68   : > { %256 = vst.msk [vmem:[%s566_s21] sm:$0x1] %vm149_vm0, %v254_v39 }
  0x6f   : > { %v260_v40 = vld [vmem:[%s566_s21] sm:$0x1] }
  0x70   : > { %v261_v41 = vmul.f32 0.00390625, %v260_v40 }
  0x72   : > { %262 = vst.msk [vmem:[%s566_s21] sm:$0x1] %vm149_vm0, %v261_v41 }
  0x73   : > { %428 = shalt.err (!%p425_p5)
}
  0x74   : > { %s429_s13 = scalar_lea.hbm %s649_s2, 16  ;;  %s433_s20 = scalar_lea.hbm %s701_s1, 32 }
  0x75   : > { %p430_p6 = scmp.ne.s32.totalorder %s649_s2, %s429_s13  ;;  %p434_p10 = scmp.lt.u32.totalorder %s649_s2, %s701_s1 }
  0x76   : > { %p435_p11 = scmp.lt.u32.totalorder %s433_s20, %s429_s13  ;;  %p437_p13 = scmp.lt.u32.totalorder %s429_s13, %s649_s2 }
  0x77   : > { %p431_p7 = pnand %p430_p6, %p547_p4 }
  0x78   : > { %p436_p12 = por %p435_p11, %p434_p10 }
  0x79   : > { %p432_p9 = pneg %p431_p7 }
  0x7a   : > { %p438_p0 = por %p437_p13, %p436_p12 }
  0x7c   : > { %p439_p1 = pnand %p438_p0, %p432_p9 }
  0x7e   : > { %442 = shalt.err (!%p439_p1)
}
  0x7f   : > { %359 = dma.vmem_to_hbm [thread:$0]  (%p547_p4), %s651_s28, 16, %s649_s2, %s264_s3  }
  0x80 PF: > { %p365_p2 = scmp.ge.s32.totalorder %s493_s11, 2  ;;  %s288_s23 = sand.u32 1, %s473_s6  }
  0x81   : > { %s289_s24 = scalar_lea.sflag [#allocation3], %s288_s23 }
  0x82   : > { %p362_p3 = pnand %p365_p2, %p554_p8 }
  0x84   : > { %468 = dma.done.wait (!%p362_p3), %s289_s24, 16  }
  0x85   : > { %470 = vsyncadd (!%p362_p3), %s289_s24, 4294967280  ;;  %s14_s11 = sadd.s32 1, %s493_s11   ;;  %s704_s6 = smov %s477_s7 }
  0x86   : > { %p11_p5 = scmp.ge.s32.totalorder %s14_s11, 4   ;;  %s705_s7 = smov %s481_s8 }
  0x87   : > { %s706_s8 = smov %s560_s19  ;;  %s707_s9 = smov %s489_s10 }
  0x88   : > { %s708_s10 = smov %s710_s14  ;;  %13 = sbr.rel (!%p11_p5) target bundleno = 4 (0x4), region = 67 }
  0x8f   :  { %293 = vsyncpa [#allocation3], 1 }
  0x90   :  { %295 = vsyncpa [#allocation3 + $0x1], 1 }

</bundles_post_ra>
